<compile_context>
chip_gen: v7x
topology: tpu7x:2x2x1
jax: 0.10.0
libtpu: 0.0.40
codegen_flags: <defaults>
</compile_context>

<pallas_src>
import functools

import jax
import jax.numpy as jnp
import numpy as np
from jax.experimental import pallas as pl
from jax.experimental.pallas import tpu as pltpu

BN_EPS = 1e-5
LANES = 128
DEFAULT_TILE_M = 512          # row tile for the 1x1 matmul kernels
CONV2_TILE_H = 32             # output-row tile for the 3x3 conv kernel
# bf16 activation/weight streams; accumulation stays f32 in-kernel, folded BN scale/bias
# stay f32, and the block's final output is stored in f32.
MATMUL_DTYPE = jnp.bfloat16
MM_ITEMSIZE = np.dtype(MATMUL_DTYPE).itemsize
SUBLANES = 8 * (4 // MM_ITEMSIZE)     # 16 for bf16, 8 for f32 (sublane packing)


# ---------------- Pallas kernels (hot path) ----------------

def _matmul_bn_relu_kernel(x_ref, w_ref, scale_ref, bias_ref, o_ref):
    # fused 1x1 conv (as (TILE_M, K) @ (K, C) matmul) + folded BN + ReLU.
    acc = jnp.dot(x_ref[...], w_ref[...], preferred_element_type=jnp.float32)
    o_ref[...] = jnp.maximum(acc * scale_ref[...] + bias_ref[...], 0.0).astype(o_ref.dtype)


def _conv3x3_bn_relu_kernel(h1_hbm, w_ref, scale_ref, bias_ref, o_ref, xbuf, sem, *,
                            dilation):
    # h1_hbm : (N, Hp, Wp, Cin_tot) HBM-resident, spatially zero-padded conv1 output.
    # w_ref  : (G, 3, 3, cin_g, cout_g) VMEM-resident weights (G=1 => dense/block-diag).
    # o_ref  : (1, tile_h, Wo, Cout_tot) output row-tile.
    # xbuf   : (2, tile_h + 2d, Wp, Cin_tot) double-buffered halo windows.
    d = dilation
    n = pl.program_id(0)
    i = pl.program_id(1)
    nh = pl.num_programs(1)
    _, tile_h, wo, cout = o_ref.shape
    _, rows_in, wp, _ = xbuf.shape
    g, _, _, cin_g, cout_g = w_ref.shape

    slot = i % 2

    def issue(row_tile, sl):
        pltpu.make_async_copy(
            h1_hbm.at[n, pl.ds(row_tile * tile_h, rows_in)],
            xbuf.at[sl], sem.at[sl]).start()

    @pl.when(i == 0)
    def _():
        issue(0, slot)                      # first row-tile of this image: fetch now

    @pl.when(i + 1 < nh)
    def _():
        issue(i + 1, 1 - slot)              # prefetch next row-tile of the same image

    # wait for the current window (descriptor only needs matching shapes / semaphore).
    pltpu.make_async_copy(h1_hbm.at[n, pl.ds(0, rows_in)], xbuf.at[slot],
                          sem.at[slot]).wait()

    win = xbuf[slot]                        # (rows_in, wp, g*cin_g) halo window, bf16

    # 3x3 conv = 9 accumulated matmuls over H-shifted slabs (no materialized im2col).
    # Per-kw partial sums are kept full-width and aligned with one XLU roll per kw
    # instead of 9 sublane-misaligned result slices.
    acc = jnp.zeros((tile_h, wp, cout), jnp.float32)
    for kw in range(3):
        parts = []
        for gi in range(g):
            z = jnp.zeros((tile_h * wp, cout_g), jnp.float32)
            for kh in range(3):
                slab = win[kh * d:kh * d + tile_h, :, gi * cin_g:(gi + 1) * cin_g]
                z = z + jnp.dot(slab.reshape(tile_h * wp, cin_g), w_ref[gi, kh, kw],
                                preferred_element_type=jnp.float32)
            parts.append(z.reshape(tile_h, wp, cout_g))
        zkw = parts[0] if g == 1 else jnp.concatenate(parts, axis=-1)
        if kw == 0:
            acc = acc + zkw
        else:
            # out[:, c] needs in[:, c + kw*d]; wrapped-around columns land at
            # c >= wp - 2d >= wo and are sliced off below.
            acc = acc + pltpu.roll(zkw, shift=wp - kw * d, axis=1)
    res = acc[:, :wo, :] * scale_ref[...] + bias_ref[...]
    o_ref[0] = jnp.maximum(res, 0.0).astype(o_ref.dtype)


def _conv3_ds_add_relu_kernel(h_ref, w3_ref, s3_ref, b3_ref,
                              xd_ref, wd_ref, sd_ref, bd_ref, o_ref):
    # fused: out = relu( BN3(h @ W3) + BNd(x_ds @ Wd) )   (downsample branch fused in)
    main = jnp.dot(h_ref[...], w3_ref[...], preferred_element_type=jnp.float32)
    main = main * s3_ref[...] + b3_ref[...]
    iden = jnp.dot(xd_ref[...], wd_ref[...], preferred_element_type=jnp.float32)
    iden = iden * sd_ref[...] + bd_ref[...]
    o_ref[...] = jnp.maximum(main + iden, 0.0).astype(o_ref.dtype)


def _conv3_add_relu_kernel(h_ref, w3_ref, s3_ref, b3_ref, id_ref, o_ref):
    # fused: out = relu( BN3(h @ W3) + identity )  (identity kept in f32)
    main = jnp.dot(h_ref[...], w3_ref[...], preferred_element_type=jnp.float32)
    o_ref[...] = jnp.maximum(main * s3_ref[...] + b3_ref[...] + id_ref[...],
                             0.0).astype(o_ref.dtype)


# ---------------- wrapper glue (layout, BN folding, weight packing) ----------------

def _round_up(v, m):
    return (v + m - 1) // m * m


def _fold_bn(bn, c_pad):
    gamma, beta, mean, var = bn
    scale = (gamma / jnp.sqrt(var + BN_EPS)).astype(jnp.float32)
    bias = (beta - mean * scale).astype(jnp.float32)
    c = gamma.shape[0]
    scale = jnp.pad(scale, (0, c_pad - c)).reshape(1, c_pad)
    bias = jnp.pad(bias, (0, c_pad - c)).reshape(1, c_pad)
    return scale, bias


def _w1x1(w, c_in_pad, c_out_pad):
    # torch (Cout, Cin, 1, 1) -> (Cin_pad, Cout_pad), zero-padded, matmul dtype.
    c_out, c_in = w.shape[0], w.shape[1]
    w2d = jnp.transpose(w.reshape(c_out, c_in), (1, 0))
    return jnp.pad(w2d, ((0, c_in_pad - c_in), (0, c_out_pad - c_out))).astype(MATMUL_DTYPE)


def _w3x3_dense(w, cb, groups, cb_pad):
    # grouped torch (Cb, Cb//groups, 3, 3) -> dense block-diagonal (1, 3, 3, Cb_p, Cb_p).
    # Only used when Cb//groups < 128 (per-group width below the MXU lane width).
    cpg = cb // groups
    w_t = jnp.transpose(w, (2, 3, 1, 0))                       # (3, 3, cpg, cb)
    dense = jnp.zeros((3, 3, cb, cb), w.dtype)
    for gi in range(groups):
        sl = slice(gi * cpg, (gi + 1) * cpg)
        dense = dense.at[:, :, sl, sl].set(w_t[:, :, :, sl])
    dense = jnp.pad(dense, ((0, 0), (0, 0), (0, cb_pad - cb), (0, cb_pad - cb)))
    return dense[None].astype(MATMUL_DTYPE)                    # (1, 3, 3, Cb_p, Cb_p)


def _w3x3_grouped(w, cb, groups):
    # grouped torch (Cb, Cb//groups, 3, 3) -> (G, 3, 3, cpg, cpg) without dense
    # expansion.  Used when cpg % 128 == 0 (lane-aligned per-group channel slices).
    cpg = cb // groups
    w_t = jnp.transpose(w, (2, 3, 1, 0))                       # (3, 3, cpg, cb)
    stacked = jnp.stack([w_t[:, :, :, gi * cpg:(gi + 1) * cpg] for gi in range(groups)],
                        axis=0)
    return stacked.astype(MATMUL_DTYPE)


def _call_rowtiled(kernel, args, n_out, out_dtype=jnp.float32, tile_m=DEFAULT_TILE_M):
    # args: ordered list of (array, tiled_over_rows).  Row-tiled arrays share M.
    # Ragged last row block is handled by Pallas edge masking (garbage rows never hit
    # HBM), so no explicit row padding / slicing copies are needed.
    m = next(a.shape[0] for a, tiled in args if tiled)
    tile_m = min(tile_m, m)                 # full-extent block when M is small
    grid_m = pl.cdiv(m, tile_m)
    ins, in_specs = [], []
    flop_k = 0
    bytes_accessed = m * n_out * np.dtype(out_dtype).itemsize
    for a, tiled in args:
        if tiled:
            in_specs.append(pl.BlockSpec((tile_m, a.shape[1]), lambda i: (i, 0)))
            flop_k += a.shape[1]            # (slight overcount for the identity operand)
        else:
            # TODO(synk): pipeline_mode=pl.Buffered(1) here would halve the VMEM of these
            # constant-index operands once single-buffering is verified on this jax rev.
            in_specs.append(pl.BlockSpec(a.shape, lambda i, nd=a.ndim: (0,) * nd))
        bytes_accessed += int(a.nbytes)
        ins.append(a)
    return pl.pallas_call(
        kernel,
        out_shape=jax.ShapeDtypeStruct((m, n_out), out_dtype),
        grid=(grid_m,),
        in_specs=in_specs,
        out_specs=pl.BlockSpec((tile_m, n_out), lambda i: (i, 0)),
        compiler_params=pltpu.CompilerParams(dimension_semantics=("parallel",)),
        cost_estimate=pl.CostEstimate(flops=2 * m * n_out * flop_k,
                                      transcendentals=0,
                                      bytes_accessed=int(bytes_accessed)),
    )(*ins)


def _conv2_call(h1, w2, s2, b2, *, dilation):
    # conv2: 3x3 grouped/dilated conv + BN + ReLU, row-tiled over H with a manually
    # double-buffered halo window DMA'd from HBM.
    N, H1, W1, c = h1.shape
    d = dilation
    tile_h = min(CONV2_TILE_H, H1)
    n_h = pl.cdiv(H1, tile_h)
    rows_in = tile_h + 2 * d
    Wp = _round_up(W1 + 2 * d, SUBLANES)
    Hp = n_h * tile_h + 2 * d
    # TODO(synk): have conv1 emit this halo-padded layout directly (or clamp+mask the
    # halo DMA in-kernel) to remove this extra HBM pass over the largest intermediate.
    h1_pad = jnp.pad(h1, ((0, 0), (d, Hp - H1 - d), (d, Wp - W1 - d), (0, 0)))

    g, _, _, cin_g, cout_g = w2.shape
    est = (2 * rows_in * Wp * c * MM_ITEMSIZE        # double-buffered input windows
           + 2 * int(w2.size) * MM_ITEMSIZE          # weights (default double-buffered)
           + 2 * tile_h * W1 * c * MM_ITEMSIZE       # double-buffered output blocks
           + 2 * tile_h * Wp * c * 4                 # f32 accumulator / tap temporaries
           + rows_in * Wp * c * MM_ITEMSIZE)         # in-kernel window value
    vmem_limit = int(min(96 * 2 ** 20, max(32 * 2 ** 20, 2 * est)))

    flops = 2 * N * H1 * W1 * 9 * g * cin_g * cout_g
    bytes_accessed = int(h1_pad.nbytes + w2.nbytes + s2.nbytes + b2.nbytes
                         + N * H1 * W1 * c * MM_ITEMSIZE)

    return pl.pallas_call(
        functools.partial(_conv3x3_bn_relu_kernel, dilation=d),
        out_shape=jax.ShapeDtypeStruct((N, H1, W1, c), MATMUL_DTYPE),
        grid=(N, n_h),
        in_specs=[
            pl.BlockSpec(memory_space=pl.ANY),                        # halo'd h1 in HBM
            pl.BlockSpec(w2.shape, lambda n, i, nd=w2.ndim: (0,) * nd),
            pl.BlockSpec((1, c), lambda n, i: (0, 0)),
            pl.BlockSpec((1, c), lambda n, i: (0, 0)),
        ],
        out_specs=pl.BlockSpec((1, tile_h, W1, c), lambda n, i: (n, i, 0, 0)),
        scratch_shapes=[pltpu.VMEM((2, rows_in, Wp, c), MATMUL_DTYPE),
                        pltpu.SemaphoreType.DMA((2,))],
        # H axis stays "arbitrary": the manual prefetch of the next row-tile relies on
        # in-order iteration within an image; the batch axis is sharded across cores.
        compiler_params=pltpu.CompilerParams(
            dimension_semantics=("parallel", "arbitrary"),
            vmem_limit_bytes=vmem_limit),
        cost_estimate=pl.CostEstimate(flops=flops, transcendentals=0,
                                      bytes_accessed=bytes_accessed),
    )(h1_pad, w2, s2, b2)


def bottleneck_forward(x_nchw, params, *, in_channels, bottleneck_channels,
                       out_channels, num_groups, stride_in_1x1, stride, dilation):
    N, Cin, H, W = x_nchw.shape
    assert Cin == in_channels
    Cb, Cout, g, d = bottleneck_channels, out_channels, num_groups, dilation

    has_downsample = in_channels != out_channels
    down_stride = stride if dilation == 1 else 1
    eff_stride = 1 if dilation > 1 else stride
    stride_1x1, stride_3x3 = (eff_stride, 1) if stride_in_1x1 else (1, eff_stride)
    if not has_downsample:
        # matches the PyTorch module: no downsample => residual shapes must match.
        assert eff_stride == 1, "in==out with stride>1 has no identity of matching shape"

    Cb_p = _round_up(Cb, LANES)
    Cout_p = _round_up(Cout, LANES)

    # TODO(synk): keep activations NHWC end-to-end in the surrounding model to drop
    # these two transposes (each is a full HBM pass the kernels cannot hide).
    x = jnp.transpose(x_nchw, (0, 2, 3, 1)).astype(jnp.float32)        # NHWC

    # ---- conv1 (1x1, stride_1x1) + BN1 + ReLU : M-tiled matmul kernel ----
    x_s1 = x[:, ::stride_1x1, ::stride_1x1, :]
    _, H1, W1, _ = x_s1.shape
    x1_2d = x_s1.reshape(N * H1 * W1, Cin).astype(MATMUL_DTYPE)
    w1 = _w1x1(params["w1"], Cin, Cb_p)
    s1, b1 = _fold_bn(params["bn1"], Cb_p)
    h1 = _call_rowtiled(_matmul_bn_relu_kernel,
                        [(x1_2d, True), (w1, False), (s1, False), (b1, False)],
                        Cb_p, out_dtype=MATMUL_DTYPE)
    h1 = h1.reshape(N, H1, W1, Cb_p)

    # ---- conv2 (3x3, groups, dilation) + BN2 + ReLU ----
    cpg = Cb // g
    if g > 1 and cpg % LANES == 0:
        w2 = _w3x3_grouped(params["w2"], Cb, g)            # per-group contraction
    else:
        w2 = _w3x3_dense(params["w2"], Cb, g, Cb_p)        # dense (cpg < MXU lane width)
    s2, b2 = _fold_bn(params["bn2"], Cb_p)
    h2 = _conv2_call(h1, w2, s2, b2, dilation=d)
    if stride_3x3 > 1:
        # TODO(synk): fold stride_3x3 into the conv2 kernel (strided slab reads / output
        # column selection) instead of computing at full resolution and subsampling.
        h2 = h2[:, ::stride_3x3, ::stride_3x3, :]

    # ---- conv3 (1x1) + BN3 + residual + ReLU (downsample conv/BN fused in) ----
    _, Ho, Wo, _ = h2.shape
    M2 = N * Ho * Wo
    h2_2d = h2.reshape(M2, Cb_p)
    w3 = _w1x1(params["w3"], Cb_p, Cout_p)
    s3, b3 = _fold_bn(params["bn3"], Cout_p)

    if has_downsample:
        if stride_1x1 == down_stride and stride_3x3 == 1:
            xd_2d = x1_2d                               # reuse conv1's strided gather
        else:
            xd_2d = x[:, ::down_stride, ::down_stride, :].reshape(M2, Cin).astype(MATMUL_DTYPE)
        wd = _w1x1(params["wd"], Cin, Cout_p)
        sd, bd = _fold_bn(params["bnd"], Cout_p)
        out2d = _call_rowtiled(
            _conv3_ds_add_relu_kernel,
            [(h2_2d, True), (w3, False), (s3, False), (b3, False),
             (xd_2d, True), (wd, False), (sd, False), (bd, False)],
            Cout_p)
    else:
        iden = x if Cout_p == Cin else jnp.pad(x, ((0, 0), (0, 0), (0, 0), (0, Cout_p - Cin)))
        out2d = _call_rowtiled(
            _conv3_add_relu_kernel,
            [(h2_2d, True), (w3, False), (s3, False), (b3, False),
             (iden.reshape(M2, Cout_p), True)],
            Cout_p)

    out = out2d.reshape(N, Ho, Wo, Cout_p)[:, :, :, :Cout]
    return jnp.transpose(out, (0, 3, 1, 2))                            # back to NCHW


# ---------------- pure-JAX reference for verification ----------------

def bottleneck_reference(x, params, *, in_channels, bottleneck_channels, out_channels,
                         num_groups, stride_in_1x1, stride, dilation):
    def bn(y, bnp):
        gamma, beta, mean, var = bnp
        s = gamma / jnp.sqrt(var + BN_EPS)
        b = beta - mean * s
        return y * s[None, :, None, None] + b[None, :, None, None]

    def conv(y, w, s, pad=0, dil=1, groups=1):
        return jax.lax.conv_general_dilated(
            y, w, (s, s), [(pad, pad), (pad, pad)],
            rhs_dilation=(dil, dil), feature_group_count=groups,
            dimension_numbers=("NCHW", "OIHW", "NCHW"),
            precision=jax.lax.Precision.HIGHEST)

    has_downsample = in_channels != out_channels
    down_stride = stride if dilation == 1 else 1
    eff_stride = 1 if dilation > 1 else stride
    s1, s3 = (eff_stride, 1) if stride_in_1x1 else (1, eff_stride)

    identity = x
    out = jnp.maximum(bn(conv(x, params["w1"], s1), params["bn1"]), 0.0)
    out = jnp.maximum(bn(conv(out, params["w2"], s3, pad=dilation, dil=dilation,
                              groups=num_groups), params["bn2"]), 0.0)
    out = bn(conv(out, params["w3"], 1), params["bn3"])
    if has_downsample:
        identity = bn(conv(x, params["wd"], down_stride), params["bnd"])
    return jnp.maximum(out + identity, 0.0)


# ---------------- test ----------------

if __name__ == "__main__":
    key = jax.random.PRNGKey(0)

    def make_params(k, cin, cb, cout, groups, has_ds):
        ks = jax.random.split(k, 8)

        def kaiming(kk, shape):
            fan_in = int(np.prod(shape[1:]))
            bound = float(np.sqrt(3.0 / fan_in))    # kaiming_uniform_(a=1)
            return jax.random.uniform(kk, shape, minval=-bound, maxval=bound,
                                      dtype=jnp.float32)

        def bn_params(kk, c):
            k1, k2, k3, k4 = jax.random.split(kk, 4)
            return (1.0 + 0.1 * jax.random.normal(k1, (c,), jnp.float32),
                    0.1 * jax.random.normal(k2, (c,), jnp.float32),
                    0.05 * jax.random.normal(k3, (c,), jnp.float32),
                    1.0 + 0.1 * jax.random.uniform(k4, (c,), jnp.float32))

        p = {"w1": kaiming(ks[0], (cb, cin, 1, 1)), "bn1": bn_params(ks[1], cb),
             "w2": kaiming(ks[2], (cb, cb // groups, 3, 3)), "bn2": bn_params(ks[3], cb),
             "w3": kaiming(ks[4], (cout, cb, 1, 1)), "bn3": bn_params(ks[5], cout)}
        if has_ds:
            p["wd"] = kaiming(ks[6], (cout, cin, 1, 1))
            p["bnd"] = bn_params(ks[7], cout)
        return p

    configs = [
        # (name,                        N, H,  W,  cin, cb, cout, groups, s_in_1x1, stride, dil)
        ("downsample_stride2",          2, 16, 16, 64,  64, 128,  1,      True,     2,      1),
        ("identity_groups_dilation",    2, 16, 16, 128, 64, 128,  2,      False,    1,      2),
    ]
    for (name, N, H, W, cin, cb, cout, groups, s11, stride, dil) in configs:
        key, kx, kp = jax.random.split(key, 3)
        x = jax.random.normal(kx, (N, cin, H, W), dtype=jnp.float32)
        params = make_params(kp, cin, cb, cout, groups, cin != cout)
        kwargs = dict(in_channels=cin, bottleneck_channels=cb, out_channels=cout,
                      num_groups=groups, stride_in_1x1=s11, stride=stride, dilation=dil)
        out = jax.block_until_ready(bottleneck_forward(x, params, **kwargs))
        ref = jax.block_until_ready(bottleneck_reference(x, params, **kwargs))
        assert out.shape == ref.shape, (name, out.shape, ref.shape)
        # bf16 activation/weight streams vs a full-f32 reference -> loosened tolerances.
        np.testing.assert_allclose(np.asarray(out), np.asarray(ref),
                                   rtol=5e-2, atol=1e-1, err_msg=name)

    print("KERNEL_OK")
</pallas_src>

<mosaic_0001>
module attributes {stable_mosaic.version = 11 : i64} {
  func.func @_matmul_bn_relu_kernel(%arg0: i32, %arg1: memref<128x64xbf16, #tpu.memory_space<vmem>>, %arg2: memref<64x128xbf16, #tpu.memory_space<vmem>>, %arg3: memref<1x128xf32, #tpu.memory_space<vmem>>, %arg4: memref<1x128xf32, #tpu.memory_space<vmem>>, %arg5: memref<128x128xbf16, #tpu.memory_space<vmem>>) attributes {dimension_semantics = [#tpu.dimension_semantics<parallel>], iteration_bounds = array<i64: 1>, scalar_prefetch = 0 : i64, scratch_operands = 0 : i64, tpu.core_type = #tpu.core_type<tc>, window_params = [{transform_indices = @transform_0, window_bounds = array<i64: 128, 64>}, {pipeline_mode = #tpu.pipeline_mode<synchronous>, transform_indices = @transform_1, window_bounds = array<i64: 64, 128>}, {pipeline_mode = #tpu.pipeline_mode<synchronous>, transform_indices = @transform_2, window_bounds = array<i64: 1, 128>}, {pipeline_mode = #tpu.pipeline_mode<synchronous>, transform_indices = @transform_3, window_bounds = array<i64: 1, 128>}, {transform_indices = @transform_4, window_bounds = array<i64: 128, 128>}]} {
    %c0 = arith.constant 0 : index
    %c0_0 = arith.constant 0 : index
    %0 = vector.load %arg1[%c0, %c0_0] : memref<128x64xbf16, #tpu.memory_space<vmem>>, vector<128x64xbf16>
    %c0_1 = arith.constant 0 : index
    %c0_2 = arith.constant 0 : index
    %1 = vector.load %arg2[%c0_1, %c0_2] : memref<64x128xbf16, #tpu.memory_space<vmem>>, vector<64x128xbf16>
    %cst = arith.constant dense<0.000000e+00> : vector<128x128xf32>
    %2 = tpu.matmul %0, %1, %cst {dimension_numbers = #tpu.dot_dimension_numbers<[1], [0], [0], [1], [0, 0, 1, 1], [], []>} : vector<128x64xbf16>, vector<64x128xbf16>, vector<128x128xf32> -> vector<128x128xf32>
    %c0_3 = arith.constant 0 : index
    %c0_4 = arith.constant 0 : index
    %3 = vector.load %arg3[%c0_3, %c0_4] : memref<1x128xf32, #tpu.memory_space<vmem>>, vector<1x128xf32>
    %4 = vector.broadcast %3 : vector<1x128xf32> to vector<128x128xf32>
    %5 = arith.mulf %2, %4 : vector<128x128xf32>
    %c0_5 = arith.constant 0 : index
    %c0_6 = arith.constant 0 : index
    %6 = vector.load %arg4[%c0_5, %c0_6] : memref<1x128xf32, #tpu.memory_space<vmem>>, vector<1x128xf32>
    %7 = vector.broadcast %6 : vector<1x128xf32> to vector<128x128xf32>
    %8 = arith.addf %5, %7 : vector<128x128xf32>
    %cst_7 = arith.constant 0.000000e+00 : f32
    %9 = vector.broadcast %cst_7 : f32 to vector<128x128xf32>
    %10 = arith.maximumf %8, %9 : vector<128x128xf32>
    %11 = arith.truncf %10 : vector<128x128xf32> to vector<128x128xbf16>
    %c0_8 = arith.constant 0 : index
    %c0_9 = arith.constant 0 : index
    %12 = vector.load %arg5[%c0_8, %c0_9] : memref<128x128xbf16, #tpu.memory_space<vmem>>, vector<128x128xbf16>
    tpu.vector_store %arg5[%c0_8, %c0_9], %11 {strides = array<i32>} : memref<128x128xbf16, #tpu.memory_space<vmem>>, vector<128x128xbf16>,
    return
  }
  func.func @transform_0(%arg0: i32) -> (i32, i32) {
    %c0_i32 = arith.constant 0 : i32
    %c0_i32_0 = arith.constant 0 : i32
    return %arg0, %c0_i32 : i32, i32
  }
  func.func @transform_1(%arg0: i32) -> (i32, i32) {
    %c0_i32 = arith.constant 0 : i32
    %c0_i32_0 = arith.constant 0 : i32
    %c0_i32_1 = arith.constant 0 : i32
    return %c0_i32, %c0_i32_0 : i32, i32
  }
  func.func @transform_2(%arg0: i32) -> (i32, i32) {
    %c0_i32 = arith.constant 0 : i32
    %c0_i32_0 = arith.constant 0 : i32
    %c0_i32_1 = arith.constant 0 : i32
    return %c0_i32, %c0_i32_0 : i32, i32
  }
  func.func @transform_3(%arg0: i32) -> (i32, i32) {
    %c0_i32 = arith.constant 0 : i32
    %c0_i32_0 = arith.constant 0 : i32
    %c0_i32_1 = arith.constant 0 : i32
    return %c0_i32, %c0_i32_0 : i32, i32
  }
  func.func @transform_4(%arg0: i32) -> (i32, i32) {
    %c0_i32 = arith.constant 0 : i32
    %c0_i32_0 = arith.constant 0 : i32
    return %arg0, %c0_i32 : i32, i32
  }
}

</mosaic_0001>

<bundles_post_ra>
// kernel: tpu_custom_call.1
= control target key start
LH: loop header
LB: loop body
LE: loop exit
PB: predicated region body
PF: predicated region fallthrough
CT: control target
= control target key end

     0   :  { %vm107_vm0 = vcmask 523264   ;;  %s679_s0 = inlined_call_operand.vmem [shape: bf16[128,64], index: 0, kind: input, shape index: {}]   ;;  %s680_s1 = inlined_call_operand.vmem [shape: bf16[64,128], index: 1, kind: input, shape index: {}]   ;;  %s681_s2 = inlined_call_operand.vmem [shape: f32[1,128], index: 2, kind: input, shape index: {}]   ;;  %s682_s3 = inlined_call_operand.vmem [shape: f32[1,128], index: 3, kind: input, shape index: {}]   ;;  %s683_s4 = inlined_call_operand.hbm [shape: bf16[128,128], index: 4, kind: output, shape index: {}]  }
   0x1   :  { %v535_v0 = vld [vmem:[%s680_s1] sm:$0xff]   ;;  %v536_v1 = vld [vmem:[%s680_s1 + $0x8] sm:$0xff]   ;;  %v537_v2 = vld [vmem:[%s680_s1 + $0x10] sm:$0xff]  }
   0x2   :  { %500 = vmatprep.subr.bf16.mxu0 %v535_v0  ;;  %524 = vmatprep.subr.bf16.mxu1 %v535_v0  ;;  %v539_v3 = vld [vmem:[%s679_s0] sm:$0xff]   ;;  %v538_v5 = vld [vmem:[%s680_s1 + $0x18] sm:$0xff]  }
   0x3   :  { %501 = vmatpush3.bf16.msra.mxu0 %v535_v0  ;;  %528 = vmatpush3.bf16.msra.mxu1 %v535_v0  ;;  %v540_v4 = vld [vmem:[%s679_s0 + $0x20] sm:$0xff]  }
   0x4   :  { %502 = vmatprep.subr.bf16.mxu0 %v536_v1  ;;  %525 = vmatprep.subr.bf16.mxu1 %v536_v1 }
   0x5   :  { %508 = vmatprep.mubr.msk.bf16.mxu0 %vm107_vm0, %v539_v3  ;;  %516 = vmatprep.mubr.msk.bf16.mxu1 %vm107_vm0, %v540_v4 }
   0x7   :  { %503 = vmatpush3.bf16.msra.mxu0 %v536_v1  ;;  %529 = vmatpush3.bf16.msra.mxu1 %v536_v1 }
   0x8   :  { %504 = vmatprep.subr.bf16.mxu0 %v537_v2  ;;  %526 = vmatprep.subr.bf16.mxu1 %v537_v2 }
   0xb   :  { %505 = vmatpush3.bf16.msra.mxu0 %v537_v2  ;;  %530 = vmatpush3.bf16.msra.mxu1 %v537_v2 }
   0xc   :  { %506 = vmatprep.subr.bf16.mxu0 %v538_v5  ;;  %527 = vmatprep.subr.bf16.mxu1 %v538_v5 }
   0xd   :  { %9 = vsyncpa [#allocation3], 0  ;;  %v541_v6 = vld [vmem:[%s679_s0 + $0x8] sm:$0xff]   ;;  %v543_v8 = vld [vmem:[%s679_s0 + $0x10] sm:$0xff]  }
   0xe   :  { %v542_v7 = vld [vmem:[%s679_s0 + $0x28] sm:$0xff]   ;;  %v544_v9 = vld [vmem:[%s679_s0 + $0x30] sm:$0xff]   ;;  %v545_v10 = vld [vmem:[%s679_s0 + $0x18] sm:$0xff]  }
   0xf   :  { %507 = vmatpush3.bf16.msra.mxu0 %v538_v5  ;;  %531 = vmatpush3.bf16.msra.mxu1 %v538_v5  ;;  %v546_v11 = vld [vmem:[%s679_s0 + $0x38] sm:$0xff]   ;;  %v407_v12 = vld [vmem:[%s681_s2] ss:$0 sm:$0xff]  ;;  %s571_s0 = smov [#allocation2]  }
  0x10   :  { %v649_v14 = vld [vmem:[%s682_s3] ss:$0 sm:$0xff]  ;;  %s376_s2 = sshll.u32 %s571_s0, 4  ;;  %s377_s2 = int_to_ptr.vmem [resolvable:$true] %s376_s2 }
  0x11   :  { %s547_s3 = scalar_lea.vmem %s377_s2, 1024  ;;  %p552_p1 = scmp.lt.s32.totalorder %s377_s2, %s377_s2 }
  0x12   :  { %509 = vmatmul.mubr.msk.bf16.vlgmr.msra.gmra.mrb[0].mxu0 %vm107_vm0, %v541_v6  ;;  %517 = vmatmul.mubr.msk.bf16.vlgmr.msra.gmra.mrb[0].mxu1 %vm107_vm0, %v542_v7  ;;  %p548_p0 = scmp.ne.s32.totalorder %s377_s2, %s547_s3  ;;  %p553_p2 = scmp.lt.s32.totalorder %s547_s3, %s547_s3 }
  0x13   :  { %512 = vmatprep.mubr.msk.bf16.mxu0 %vm107_vm0, %v543_v8  ;;  %520 = vmatprep.mubr.msk.bf16.mxu1 %vm107_vm0, %v544_v9 }
  0x14   :  { %p554_p3 = por %p553_p2, %p552_p1 }
  0x16   :  { %p555_p4 = pnand %p554_p3, %p548_p0 }
  0x1a   :  { %513 = vmatmul.mubr.msk.bf16.gmra.mrb[4].mxu0 %vm107_vm0, %v545_v10  ;;  %521 = vmatmul.mubr.msk.bf16.gmra.mrb[4].mxu1 %vm107_vm0, %v546_v11 }
  0xe5   :  { %v510_v13 = vpop.f32.mrb[0].mxu0  ;;  %v518_v15 = vpop.f32.mrb[0].mxu1 }
  0xe6   :  { %v238_v16 = vmul.f32 %v510_v13, %v407_v12  ;;  %v246_v17 = vmul.f32 %v518_v15, %v407_v12  ;;  %v166_v18 = vpop.f32.mrb[1].mxu0  ;;  %v198_v19 = vpop.f32.mrb[1].mxu1 }
  0xe7   :  { %v236_v20 = vmul.f32 %v407_v12, %v166_v18  ;;  %v244_v21 = vmul.f32 %v407_v12, %v198_v19  ;;  %v511_v22 = vpop.f32.mrb[2].mxu0  ;;  %v519_v23 = vpop.f32.mrb[2].mxu1 }
  0xe8   :  { %v261_v24 = vadd.f32 %v649_v14, %v238_v16  ;;  %v269_v25 = vadd.f32 %v649_v14, %v246_v17  ;;  %v239_v26 = vmul.f32 %v511_v22, %v407_v12  ;;  %v247_v27 = vmul.f32 %v519_v23, %v407_v12  ;;  %v169_v28 = vpop.f32.mrb[3].mxu0  ;;  %v201_v29 = vpop.f32.mrb[3].mxu1 }
  0xe9   :  { %v259_v30 = vadd.f32 %v649_v14, %v236_v20  ;;  %v267_v31 = vadd.f32 %v649_v14, %v244_v21  ;;  %v237_v32 = vmul.f32 %v407_v12, %v169_v28  ;;  %v245_v33 = vmul.f32 %v407_v12, %v201_v29 }
  0xea   :  { %v262_v34 = vadd.f32 %v649_v14, %v239_v26  ;;  %v270_v35 = vadd.f32 %v649_v14, %v247_v27  ;;  %v277_v38 = vmax.f32 %v261_v24, 0.0  ;;  %v285_v39 = vmax.f32 %v269_v25, 0.0 }
  0xeb   :  { %v260_v36 = vadd.f32 %v649_v14, %v237_v32  ;;  %v268_v37 = vadd.f32 %v649_v14, %v245_v33  ;;  %v275_v42 = vmax.f32 %v259_v30, 0.0  ;;  %v283_v43 = vmax.f32 %v267_v31, 0.0 }
  0xec   :  { %v278_v40 = vmax.f32 %v262_v34, 0.0  ;;  %v286_v41 = vmax.f32 %v270_v35, 0.0 }
  0xed   :  { %v276_v44 = vmax.f32 %v260_v36, 0.0  ;;  %v284_v45 = vmax.f32 %v268_v37, 0.0  ;;  %v514_v46 = vpop.f32.mrb[4].mxu0  ;;  %v522_v47 = vpop.f32.mrb[4].mxu1 }
  0xee   :  { %v449_v48 = vpack.c.bf16 %v278_v40, %v277_v38  ;;  %v469_v49 = vpack.c.bf16 %v286_v41, %v285_v39  ;;  %v242_v50 = vmul.f32 %v514_v46, %v407_v12  ;;  %v250_v51 = vmul.f32 %v522_v47, %v407_v12  ;;  %v182_v52 = vpop.f32.mrb[5].mxu0  ;;  %v214_v53 = vpop.f32.mrb[5].mxu1 }
  0xef   :  { %v444_v54 = vpack.c.bf16 %v276_v44, %v275_v42  ;;  %v464_v55 = vpack.c.bf16 %v284_v45, %v283_v43  ;;  %v240_v56 = vmul.f32 %v407_v12, %v182_v52  ;;  %v248_v57 = vmul.f32 %v407_v12, %v214_v53  ;;  %v515_v58 = vpop.f32.mrb[6].mxu0  ;;  %v523_v59 = vpop.f32.mrb[6].mxu1 }
  0xf0   :  { %481 = vst [vmem:[#allocation2 + $0x8] sm:$0xff] %v449_v48   ;;  %485 = vst [vmem:[#allocation2 + $0x28] sm:$0xff] %v469_v49   ;;  %v265_v60 = vadd.f32 %v649_v14, %v242_v50  ;;  %v273_v61 = vadd.f32 %v649_v14, %v250_v51  ;;  %v243_v62 = vmul.f32 %v515_v58, %v407_v12  ;;  %v185_v0 = vpop.f32.mrb[7].mxu0  ;;  %v217_v1 = vpop.f32.mrb[7].mxu1 }
  0xf1   :  { %v251_v63 = vmul.f32 %v523_v59, %v407_v12  ;;  %445 = vst [vmem:[#allocation2] sm:$0xff] %v444_v54   ;;  %484 = vst [vmem:[#allocation2 + $0x20] sm:$0xff] %v464_v55   ;;  %v263_v2 = vadd.f32 %v649_v14, %v240_v56  ;;  %v271_v3 = vadd.f32 %v649_v14, %v248_v57 }
  0xf2   :  { %v241_v4 = vmul.f32 %v407_v12, %v185_v0  ;;  %v249_v5 = vmul.f32 %v407_v12, %v217_v1  ;;  %v266_v6 = vadd.f32 %v649_v14, %v243_v62  ;;  %v281_v10 = vmax.f32 %v265_v60, 0.0 }
  0xf3   :  { %v274_v7 = vadd.f32 %v649_v14, %v251_v63  ;;  %v289_v11 = vmax.f32 %v273_v61, 0.0  ;;  %v279_v16 = vmax.f32 %v263_v2, 0.0  ;;  %v287_v17 = vmax.f32 %v271_v3, 0.0 }
  0xf4   :  { %v264_v8 = vadd.f32 %v649_v14, %v241_v4  ;;  %v272_v9 = vadd.f32 %v649_v14, %v249_v5  ;;  %v282_v13 = vmax.f32 %v266_v6, 0.0 }
  0xf5   :  { %v290_v15 = vmax.f32 %v274_v7, 0.0 }
  0xf6   :  { %v280_v18 = vmax.f32 %v264_v8, 0.0  ;;  %v288_v19 = vmax.f32 %v272_v9, 0.0  ;;  %v459_v20 = vpack.c.bf16 %v282_v13, %v281_v10 }
  0xf7   :  { %v479_v12 = vpack.c.bf16 %v290_v15, %v289_v11 }
  0xf8   :  { %v454_v21 = vpack.c.bf16 %v280_v18, %v279_v16  ;;  %v474_v22 = vpack.c.bf16 %v288_v19, %v287_v17  ;;  %483 = vst [vmem:[#allocation2 + $0x18] sm:$0xff] %v459_v20  }
  0xf9   :  { %487 = vst [vmem:[#allocation2 + $0x38] sm:$0xff] %v479_v12  }
  0xfa   :  { %482 = vst [vmem:[#allocation2 + $0x10] sm:$0xff] %v454_v21   ;;  %486 = vst [vmem:[#allocation2 + $0x30] sm:$0xff] %v474_v22  }
  0xfb   :  { %558 = shalt.err (!%p555_p4)
}
  0xfc   :  { %s559_s18 = scalar_lea.hbm %s683_s4, 1024 }
  0xfd   :  { %p560_p5 = scmp.ne.s32.totalorder %s683_s4, %s559_s18  ;;  %p563_p6 = scmp.lt.u32.totalorder %s559_s18, %s683_s4 }
  0xff   :  { %p565_p7 = pnand %p563_p6, %p560_p5 }
 0x101   :  { %568 = shalt.err (!%p565_p7)
}
 0x102   :  { %s572_s23 = smov 64   ;;  %s573_s24 = smov 4  }
 0x103   :  { %382 = dma.vmem_to_hbm [thread:$0]  %s377_s2, 1024, %s683_s4, [#allocation3], %s572_s23, %s572_s23, %s573_s24  }
 0x104   :  { %569 = dma.done.wait [#allocation3], 1024  }
 0x105   :  { %570 = vsyncadd [#allocation3], 4294966272 }
 0x106   :  { %386 = vsyncpa [#allocation3], 1 }

</bundles_post_ra>
